<compile_context>
chip_gen: v6e
topology: v6e:2x2x1
jax: 0.10.0
libtpu: 0.0.40
codegen_flags: <defaults>
</compile_context>

<pallas_src>
import jax
import jax.numpy as jnp
from jax.experimental import pallas as pl
from jax.experimental.pallas import tpu as pltpu


def _round_up(x, m):
    return (x + m - 1) // m * m


# --------------------------------------------------------------------------- #
# Kernels
# --------------------------------------------------------------------------- #
def _feat_kernel_single_k(x_ref, w_ref, b_ref, o_ref):
    """Whole contraction in one step: out = x @ (W + I).T + b (W pre-folded)."""
    acc = jnp.dot(x_ref[...], w_ref[...], preferred_element_type=jnp.float32)
    o_ref[...] = (acc + b_ref[...].astype(jnp.float32)).astype(o_ref.dtype)


def _feat_kernel_k_tiled(x_ref, w_ref, b_ref, o_ref, acc_ref):
    """K-tiled contraction with an f32 accumulator (bias seeds the acc)."""
    k = pl.program_id(2)

    @pl.when(k == 0)
    def _init():
        acc_ref[...] = jnp.broadcast_to(
            b_ref[...].astype(jnp.float32), acc_ref.shape)

    acc_ref[...] += jnp.dot(x_ref[...], w_ref[...],
                            preferred_element_type=jnp.float32)

    @pl.when(k == pl.num_programs(2) - 1)
    def _finalize():
        o_ref[...] = acc_ref[...].astype(o_ref.dtype)


# --------------------------------------------------------------------------- #
# Wrapper
# --------------------------------------------------------------------------- #
def _vmem_capacity_bytes():
    cap = 64 * 2**20                       # conservative fallback (v7x per-TC)
    try:
        info = pltpu.get_tpu_info()
        cap = int(getattr(info, "vmem_capacity_bytes", cap))
    except Exception:
        pass
    return cap


def feat_transform(x, w, b, *, tile_b=None, tile_n=None, tile_k=None):
    """out = x @ w.T + b + x   (PyTorch nn.Linear(F, F) semantics + residual)."""
    B, F = x.shape
    assert w.shape == (F, F) and b.shape == (F,)

    # Fold the residual into the weight ONCE and pre-transpose so the in-kernel
    # contraction is a plain jnp.dot over contiguous (k, n) weight slabs.
    # NOTE: the matmul runs in x.dtype (f32 accumulate); if w is wider than x
    # this is a small (documented) precision difference vs PyTorch.
    w_eff = (w.astype(jnp.float32) + jnp.eye(F, dtype=jnp.float32)).T
    w_eff = w_eff.astype(x.dtype)
    b2 = b.reshape(1, F)

    itemsize = jnp.dtype(x.dtype).itemsize
    sub = {4: 8, 2: 16, 1: 32}.get(itemsize, 8)        # sublane granularity

    vmem_cap = _vmem_capacity_bytes()
    budget = int(vmem_cap * 0.80)                      # leave Mosaic headroom

    def footprint(tb, tn, tk):
        # double-buffered x / W / out tiles + bias (+ f32 acc only when K-tiled)
        fp = (2 * tb * tk + 2 * tk * tn + 2 * tb * tn + 2 * tn) * itemsize
        if tk < F:
            fp += tb * tn * 4
        return fp

    # MXU-friendly K/N granularity: 256 for the 256x256 MXUs (v6e/v7x), else 128.
    gran = 256 if F % 256 == 0 else (128 if F % 128 == 0 else None)

    def divisor_tiles(gr):
        return [t for t in range(F, gr - 1, -gr) if F % t == 0]

    pick_k, pick_n = tile_k is None, tile_n is None
    if pick_k:
        tile_k = F                                     # prefer fully-resident W
    if pick_n:
        tile_n = F
    if gran is not None:
        if pick_k and footprint(sub, tile_n, tile_k) > budget:
            for t in divisor_tiles(gran):
                tile_k = t
                if footprint(sub, tile_n, tile_k) <= budget:
                    break
        if pick_n and footprint(sub, tile_n, tile_k) > budget:
            for t in divisor_tiles(gran):
                tile_n = t
                if footprint(sub, tile_n, tile_k) <= budget:
                    break
    assert tile_k == F or (F % tile_k == 0 and tile_k % 128 == 0), \
        "tile_k must equal F or be a multiple of 128 dividing F"
    assert tile_n == F or (F % tile_n == 0 and tile_n % 128 == 0), \
        "tile_n must equal F or be a multiple of 128 dividing F"

    # Batch tile: as large as the budget allows, preferring a divisor of the
    # sublane-aligned batch so the pad / slice round trip is skipped.
    B_al = _round_up(B, sub)
    if tile_b is None:
        tb = min(B_al, 1024)
        while tb > sub and footprint(tb, tile_n, tile_k) > budget:
            tb = max(sub, _round_up(tb // 2, sub))
        best, d = sub, sub
        while d <= tb:
            if B_al % d == 0:
                best = d
            d += sub
        tile_b = best
    assert tile_b % sub == 0, f"tile_b must be a multiple of {sub} for {x.dtype}"

    B_pad = _round_up(B, tile_b)
    x_in = jnp.pad(x, ((0, B_pad - B), (0, 0))) if B_pad != B else x

    grid = (B_pad // tile_b, F // tile_n, F // tile_k)
    nk = grid[2]

    kernel = _feat_kernel_single_k if nk == 1 else _feat_kernel_k_tiled
    scratch = [] if nk == 1 else [pltpu.VMEM((tile_b, tile_n), jnp.float32)]

    fp = footprint(tile_b, tile_n, tile_k)
    vmem_limit = int(min(int(vmem_cap * 0.85), max(32 * 2**20, 2 * fp)))

    out = pl.pallas_call(
        kernel,
        out_shape=jax.ShapeDtypeStruct((B_pad, F), x.dtype),
        grid_spec=pltpu.PrefetchScalarGridSpec(
            num_scalar_prefetch=0,
            grid=grid,
            in_specs=[
                pl.BlockSpec((tile_b, tile_k), lambda i, n, k: (i, k)),   # x
                pl.BlockSpec((tile_k, tile_n), lambda i, n, k: (k, n)),   # (W+I).T
                pl.BlockSpec((1, tile_n), lambda i, n, k: (0, n)),        # bias
            ],
            out_specs=pl.BlockSpec((tile_b, tile_n), lambda i, n, k: (i, n)),
            scratch_shapes=scratch,
        ),
        compiler_params=pltpu.CompilerParams(
            dimension_semantics=("parallel", "parallel", "arbitrary"),
            vmem_limit_bytes=vmem_limit,
        ),
    )(x_in, w_eff, b2)

    return out[:B] if B_pad != B else out


if __name__ == "__main__":
    key = jax.random.PRNGKey(0)
    kx, kb, kw, kx2, kb2, kx3, kw3, kb3 = jax.random.split(key, 8)

    # ---- Case 1: module-faithful init (W = identity), small aligned shape ---
    n_feature, batch = 128, 8
    w = jnp.eye(n_feature, dtype=jnp.float32)
    bound = 1.0 / float(n_feature) ** 0.5
    b = jax.random.uniform(kb, (n_feature,), jnp.float32, -bound, bound)
    x = jax.random.normal(kx, (batch, n_feature), jnp.float32)

    out = jax.block_until_ready(feat_transform(x, w, b))
    ref = x @ w.T + b + x
    assert out.shape == (batch, n_feature)
    assert jnp.allclose(out, ref, atol=1e-5, rtol=1e-5), "mismatch (case 1)"

    # ---- Case 2: exercise batch padding + K-tiled accumulation path ---------
    B2, F2 = 300, 256
    w2 = jax.random.normal(kw, (F2, F2), jnp.float32) * 0.05
    b2 = jax.random.uniform(kb2, (F2,), jnp.float32, -0.1, 0.1)
    x2 = jax.random.normal(kx2, (B2, F2), jnp.float32)

    out2 = jax.block_until_ready(
        feat_transform(x2, w2, b2, tile_b=128, tile_k=128))
    ref2 = x2 @ w2.T + b2 + x2
    assert out2.shape == (B2, F2)
    assert jnp.allclose(out2, ref2, atol=1e-4, rtol=1e-4), "mismatch (case 2)"

    # ---- Case 3: small non-128-aligned feature width (full-dim blocks) ------
    B3, F3 = 4, 32
    w3 = jax.random.normal(kw3, (F3, F3), jnp.float32) * 0.1
    b3 = jax.random.uniform(kb3, (F3,), jnp.float32, -0.2, 0.2)
    x3 = jax.random.normal(kx3, (B3, F3), jnp.float32)

    out3 = jax.block_until_ready(feat_transform(x3, w3, b3))
    ref3 = x3 @ w3.T + b3 + x3
    assert out3.shape == (B3, F3)
    assert jnp.allclose(out3, ref3, atol=1e-5, rtol=1e-5), "mismatch (case 3)"

    print("KERNEL_OK")
</pallas_src>

<mosaic_0001>
module attributes {stable_mosaic.version = 11 : i64} {
  func.func @_feat_kernel_single_k(%arg0: i32, %arg1: i32, %arg2: i32, %arg3: memref<8x128xf32, #tpu.memory_space<vmem>>, %arg4: memref<128x128xf32, #tpu.memory_space<vmem>>, %arg5: memref<1x128xf32, #tpu.memory_space<vmem>>, %arg6: memref<8x128xf32, #tpu.memory_space<vmem>>) attributes {dimension_semantics = [#tpu.dimension_semantics<parallel>, #tpu.dimension_semantics<parallel>, #tpu.dimension_semantics<arbitrary>], iteration_bounds = array<i64: 1, 1, 1>, scalar_prefetch = 0 : i64, scratch_operands = 0 : i64, tpu.core_type = #tpu.core_type<tc>, window_params = [{transform_indices = @transform_0, window_bounds = array<i64: 8, 128>}, {transform_indices = @transform_1, window_bounds = array<i64: 128, 128>}, {transform_indices = @transform_2, window_bounds = array<i64: 1, 128>}, {transform_indices = @transform_3, window_bounds = array<i64: 8, 128>}]} {
    %c0 = arith.constant 0 : index
    %c0_0 = arith.constant 0 : index
    %0 = vector.load %arg3[%c0, %c0_0] : memref<8x128xf32, #tpu.memory_space<vmem>>, vector<8x128xf32>
    %c0_1 = arith.constant 0 : index
    %c0_2 = arith.constant 0 : index
    %1 = vector.load %arg4[%c0_1, %c0_2] : memref<128x128xf32, #tpu.memory_space<vmem>>, vector<128x128xf32>
    %cst = arith.constant dense<0.000000e+00> : vector<8x128xf32>
    %2 = tpu.matmul %0, %1, %cst {dimension_numbers = #tpu.dot_dimension_numbers<[1], [0], [0], [1], [0, 0, 1, 1], [], []>} : vector<8x128xf32>, vector<128x128xf32>, vector<8x128xf32> -> vector<8x128xf32>
    %c0_3 = arith.constant 0 : index
    %c0_4 = arith.constant 0 : index
    %3 = vector.load %arg5[%c0_3, %c0_4] : memref<1x128xf32, #tpu.memory_space<vmem>>, vector<1x128xf32>
    %4 = vector.broadcast %3 : vector<1x128xf32> to vector<8x128xf32>
    %5 = arith.addf %2, %4 : vector<8x128xf32>
    %c0_5 = arith.constant 0 : index
    %c0_6 = arith.constant 0 : index
    %6 = vector.load %arg6[%c0_5, %c0_6] : memref<8x128xf32, #tpu.memory_space<vmem>>, vector<8x128xf32>
    tpu.vector_store %arg6[%c0_5, %c0_6], %5 {strides = array<i32>} : memref<8x128xf32, #tpu.memory_space<vmem>>, vector<8x128xf32>,
    return
  }
  func.func @transform_0(%arg0: i32, %arg1: i32, %arg2: i32) -> (i32, i32) {
    %c0_i32 = arith.constant 0 : i32
    return %arg0, %arg2 : i32, i32
  }
  func.func @transform_1(%arg0: i32, %arg1: i32, %arg2: i32) -> (i32, i32) {
    %c0_i32 = arith.constant 0 : i32
    return %arg2, %arg1 : i32, i32
  }
  func.func @transform_2(%arg0: i32, %arg1: i32, %arg2: i32) -> (i32, i32) {
    %c0_i32 = arith.constant 0 : i32
    %c0_i32_0 = arith.constant 0 : i32
    return %c0_i32, %arg1 : i32, i32
  }
  func.func @transform_3(%arg0: i32, %arg1: i32, %arg2: i32) -> (i32, i32) {
    %c0_i32 = arith.constant 0 : i32
    return %arg0, %arg1 : i32, i32
  }
}

</mosaic_0001>

<bundles_post_ra>
// kernel: tpu_custom_call.1
= control target key start
LH: loop header
LB: loop body
LE: loop exit
PB: predicated region body
PF: predicated region fallthrough
CT: control target
= control target key end

     0   :  { %8 = vsyncpa [#allocation3], 0  ;;  %s317_s0 = inlined_call_operand.hbm [shape: f32[8,128], index: 0, kind: input, shape index: {}]   ;;  %s318_s1 = inlined_call_operand.hbm [shape: f32[128,128], index: 1, kind: input, shape index: {}]   ;;  %s319_s2 = inlined_call_operand.vmem [shape: f32[1,128], index: 2, kind: input, shape index: {}]   ;;  %s320_s3 = inlined_call_operand.hbm [shape: f32[8,128], index: 3, kind: output, shape index: {}]  }
   0x1   :  { %9 = vsyncpa [#allocation6], 0 }
   0x2   :  { %10 = vsyncpa [#allocation4], 0  ;;  %s278_s12 = smov [#allocation2]   ;;  %s279_s14 = smov [#allocation5]  }
   0x3   :  { %s17_s13 = sshll.u32 %s278_s12, 4  ;;  %s26_s15 = sshll.u32 %s279_s14, 4  ;;  %s18_s13 = int_to_ptr.vmem [resolvable:$true] %s17_s13  ;;  %s27_s15 = int_to_ptr.vmem [resolvable:$true] %s26_s15 }
   0x4   :  { %s220_s16 = scalar_lea.vmem %s18_s13, 128  ;;  %p225_p1 = scmp.lt.s32.totalorder %s18_s13, %s18_s13 }
   0x5   :  { %p221_p0 = scmp.ne.s32.totalorder %s18_s13, %s220_s16  ;;  %p226_p2 = scmp.lt.s32.totalorder %s220_s16, %s220_s16 }
   0x7   :  { %p227_p3 = por %p226_p2, %p225_p1 }
   0x9   :  { %p228_p4 = pnand %p227_p3, %p221_p0 }
   0xb   :  { %231 = shalt.err (!%p228_p4)
}
   0xc   :  { %20 = dma.hbm_to_vmem [thread:$0]  %s317_s0, 128, %s18_s13, [#allocation3]  }
   0xd   :  { %s240_s19 = scalar_lea.vmem %s27_s15, 2048  ;;  %p245_p6 = scmp.lt.s32.totalorder %s27_s15, %s27_s15 }
   0xe   :  { %p241_p5 = scmp.ne.s32.totalorder %s27_s15, %s240_s19  ;;  %p246_p7 = scmp.lt.s32.totalorder %s240_s19, %s240_s19 }
  0x10   :  { %p247_p8 = por %p246_p7, %p245_p6 }
  0x12   :  { %p248_p9 = pnand %p247_p8, %p241_p5 }
  0x14   :  { %251 = shalt.err (!%p248_p9)
}
  0x15   :  { %s280_s20 = smov 128   ;;  %s281_s21 = smov 8  }
  0x16   :  { %32 = dma.hbm_to_vmem [thread:$0]  %s318_s1, 2048, %s27_s15, [#allocation6], %s280_s20, %s280_s20, %s281_s21  }
  0x17   :  { %272 = dma.done.wait [#allocation3], 128  }
  0x18   :  { %273 = vsyncadd [#allocation3], 4294967168 }
  0x19   :  { %274 = dma.done.wait [#allocation6], 2048  }
  0x1a   :  { %275 = vsyncadd [#allocation6], 4294965248  ;;  %v282_v0 = vmov 0.0   ;;  %vm283_vm0 = vmmov 0   ;;  %v57_v1 = vld [vmem:[#allocation5 + $0x78] sm:$0xff]  ;;  %v56_v2 = vld [vmem:[#allocation5 + $0x70] sm:$0xff] }
  0x1b   :  { %170 = vmatprep.subr.mxu0 %v282_v0  ;;  %202 = vmatprep.mubr.msk.f32.mxu0 %vm283_vm0, %v282_v0  ;;  %v55_v3 = vld [vmem:[#allocation5 + $0x68] sm:$0xff]  ;;  %v54_v4 = vld [vmem:[#allocation5 + $0x60] sm:$0xff]  ;;  %v53_v5 = vld [vmem:[#allocation5 + $0x58] sm:$0xff]  ;;  %s284_s24 = smov [#allocation7]  }
  0x1c   :  { %171 = vmatpush3.msra.mxu0 %v57_v1  ;;  %v52_v6 = vld [vmem:[#allocation5 + $0x50] sm:$0xff]  ;;  %v51_v7 = vld [vmem:[#allocation5 + $0x48] sm:$0xff]  ;;  %v50_v8 = vld [vmem:[#allocation5 + $0x40] sm:$0xff]  ;;  %s142_s25 = sshll.u32 %s284_s24, 4  ;;  %s143_s25 = int_to_ptr.vmem [resolvable:$true] %s142_s25 }
  0x1d   :  { %172 = vmatprep.subr.mxu0 %v282_v0  ;;  %v49_v9 = vld [vmem:[#allocation5 + $0x38] sm:$0xff]  ;;  %v48_v10 = vld [vmem:[#allocation5 + $0x30] sm:$0xff]  ;;  %v47_v11 = vld [vmem:[#allocation5 + $0x28] sm:$0xff]  ;;  %s252_s26 = scalar_lea.vmem %s143_s25, 128  ;;  %p257_p11 = scmp.lt.s32.totalorder %s143_s25, %s143_s25 }
  0x1e   :  { %173 = vmatpush3.msra.mxu0 %v56_v2  ;;  %v46_v12 = vld [vmem:[#allocation5 + $0x20] sm:$0xff]  ;;  %v45_v13 = vld [vmem:[#allocation5 + $0x18] sm:$0xff]  ;;  %v44_v14 = vld [vmem:[#allocation5 + $0x10] sm:$0xff]  ;;  %p253_p10 = scmp.ne.s32.totalorder %s143_s25, %s252_s26  ;;  %p258_p12 = scmp.lt.s32.totalorder %s252_s26, %s252_s26 }
  0x1f   :  { %174 = vmatprep.subr.mxu0 %v282_v0  ;;  %v43_v15 = vld [vmem:[#allocation5 + $0x8] sm:$0xff]  ;;  %v42_v16 = vld [vmem:[#allocation5] sm:$0xff]  ;;  %v41_v17 = vld [vmem:[#allocation2] sm:$0xff] }
  0x20   :  { %175 = vmatpush3.msra.mxu0 %v55_v3  ;;  %v152_v18 = vld [vmem:[%s319_s2] ss:$0 sm:$0xff]  ;;  %p259_p13 = por %p258_p12, %p257_p11 }
  0x21   :  { %176 = vmatprep.subr.mxu0 %v282_v0 }
  0x22   :  { %177 = vmatpush3.msra.mxu0 %v54_v4  ;;  %p260_p0 = pnand %p259_p13, %p253_p10 }
  0x23   :  { %178 = vmatprep.subr.mxu0 %v282_v0 }
  0x24   :  { %179 = vmatpush3.msra.mxu0 %v53_v5 }
  0x25   :  { %180 = vmatprep.subr.mxu0 %v282_v0 }
  0x26   :  { %181 = vmatpush3.msra.mxu0 %v52_v6 }
  0x27   :  { %182 = vmatprep.subr.mxu0 %v282_v0 }
  0x28   :  { %183 = vmatpush3.msra.mxu0 %v51_v7 }
  0x29   :  { %184 = vmatprep.subr.mxu0 %v282_v0 }
  0x2a   :  { %185 = vmatpush3.msra.mxu0 %v50_v8 }
  0x2b   :  { %186 = vmatprep.subr.mxu0 %v282_v0 }
  0x2c   :  { %187 = vmatpush3.msra.mxu0 %v49_v9 }
  0x2d   :  { %188 = vmatprep.subr.mxu0 %v282_v0 }
  0x2e   :  { %189 = vmatpush3.msra.mxu0 %v48_v10 }
  0x2f   :  { %190 = vmatprep.subr.mxu0 %v282_v0 }
  0x30   :  { %191 = vmatpush3.msra.mxu0 %v47_v11 }
  0x31   :  { %192 = vmatprep.subr.mxu0 %v282_v0 }
  0x32   :  { %193 = vmatpush3.msra.mxu0 %v46_v12 }
  0x33   :  { %194 = vmatprep.subr.mxu0 %v282_v0 }
  0x34   :  { %195 = vmatpush3.msra.mxu0 %v45_v13 }
  0x35   :  { %196 = vmatprep.subr.mxu0 %v282_v0 }
  0x36   :  { %197 = vmatpush3.msra.mxu0 %v44_v14 }
  0x37   :  { %198 = vmatprep.subr.mxu0 %v282_v0 }
  0x38   :  { %199 = vmatpush3.msra.mxu0 %v43_v15 }
  0x39   :  { %200 = vmatprep.subr.mxu0 %v282_v0 }
  0x3a   :  { %201 = vmatpush3.msra.mxu0 %v42_v16 }
  0x3b   :  { %203 = vmatmul.mubr.f32.vlgmr.msra.gmra.mxu0 %v41_v17 }
  0xfb   :  { %v131_v19 = vpop.f32.mrf.mxu0 }
  0xfc   :  { %v132_v20 = vadd.f32 %v152_v18, %v131_v19 }
  0xfd   :  { %v204_v21 = vpop.f32.mrf.mxu0 }
  0xfe   :  { %135 = vst [vmem:[#allocation7] sm:$0xff] %v132_v20 }
  0xff   :  { %263 = shalt.err (!%p260_p0)
}
 0x100   :  { %145 = dma.vmem_to_hbm [thread:$0]  %s143_s25, 128, %s320_s3, [#allocation4]  }
 0x101   :  { %276 = dma.done.wait [#allocation4], 128  }
 0x102   :  { %277 = vsyncadd [#allocation4], 4294967168 }
 0x103   :  { %149 = vsyncpa [#allocation3], 1 }
 0x104   :  { %150 = vsyncpa [#allocation6], 1 }
 0x105   :  { %151 = vsyncpa [#allocation4], 1 }

</bundles_post_ra>
